<compile_context>
chip_gen: v7x
topology: tpu7x:2x2x1
jax: 0.10.0
libtpu: 0.0.40
codegen_flags: <defaults>
</compile_context>

<pallas_src>
import jax
import jax.numpy as jnp
from jax.experimental import pallas as pl
from jax.experimental.pallas import tpu as pltpu  # noqa: F401  (TPU backend)

HIDDEN = 32  # A3TGCN out_channels


def _a3tgcn_fused_kernel(a_ref, x_ref, wg_ref, bg_ref, sp_ref,
                         wout_ref, bout_ref, out_ref):
    # A_hat @ X for every period in one matmul; x_ref is (N, P*F), layout [n, (p, f)].
    ax = jnp.dot(a_ref[...], x_ref[...], preferred_element_type=jnp.float32)    # (N, P*F)

    # Both fused (GCNConv -> Linear) gates in ONE matmul: columns [0, PH) are the
    # update gate, [PH, 2*PH) the candidate.  PH = P*HIDDEN is a multiple of 128
    # here, so the split is a lane-aligned view (no relayout).
    pre = (jnp.dot(ax, wg_ref[...], preferred_element_type=jnp.float32)
           + bg_ref[...])                                                        # (N, 2*P*H)
    ph = sp_ref.shape[0]                                                         # P*H (static)
    z = jax.nn.sigmoid(pre[:, :ph])                                              # (N, P*H)
    h_tilde = jnp.tanh(pre[:, ph:])                                              # (N, P*H)

    gated = (1.0 - z) * h_tilde          # H_t = Z*H + (1-Z)*Ht with H = 0, all periods

    # Attention-weighted sum over periods as one MXU contraction: (N,P*H)@(P*H,H).
    acc = jnp.dot(gated, sp_ref[...], preferred_element_type=jnp.float32)        # (N, H)

    h = jnp.maximum(acc, 0.0)                                                    # ReLU
    out_ref[...] = (jnp.dot(h, wout_ref[...], preferred_element_type=jnp.float32)
                    + bout_ref[...]).astype(out_ref.dtype)


def a3tgcn_forward(a_hat, x_nfp, params):
    """x_nfp: (N, F, P) float32, a_hat: (N, N) GCN-normalized adjacency."""
    N, F, P = x_nfp.shape
    H = HIDDEN
    OP = params["w_out"].shape[1]
    OPP = ((OP + 127) // 128) * 128            # lane-dense padded output width

    # ---- layout plumbing / parameter prep (pure JAX, outside the kernel) ----
    # X -> (N, P*F) with layout [n, p*F + f]  (period-major within each node row)
    x_flat = jnp.transpose(x_nfp, (0, 2, 1)).reshape(N, P * F).astype(jnp.float32)

    # Exact algebraic fusion of conv_* followed by linear_* (no nonlinearity between).
    wz_f = params["w_zc"] @ params["w_zl"]                        # (F, H)
    bz_f = params["b_zc"] @ params["w_zl"] + params["b_zl"]       # (1, H)
    wh_f = params["w_hc"] @ params["w_hl"]                        # (F, H)
    bh_f = params["b_hc"] @ params["w_hl"] + params["b_hl"]       # (1, H)

    # Block-diagonal over periods so every period runs in one 2-D matmul,
    # then concatenate z/h so BOTH gates share a single MXU matmul.
    eye_p = jnp.eye(P, dtype=jnp.float32)
    wz_blk = jnp.kron(eye_p, wz_f)                                # (P*F, P*H)
    wh_blk = jnp.kron(eye_p, wh_f)                                # (P*F, P*H)
    w_gates = jnp.concatenate([wz_blk, wh_blk], axis=1)           # (P*F, 2*P*H)
    b_gates = jnp.concatenate([jnp.tile(bz_f, (1, P)),
                               jnp.tile(bh_f, (1, P))], axis=1)   # (1, 2*P*H)

    # Attention softmax folded into a stacked-identity contraction matrix.
    probs = jax.nn.softmax(params["attention"]).astype(jnp.float32)          # (P,)
    s_prob = jnp.kron(probs[:, None], jnp.eye(H, dtype=jnp.float32))         # (P*H, H)

    # Lane-dense output head: zero-pad OP up to a multiple of 128.
    w_out_p = jnp.zeros((H, OPP), jnp.float32).at[:, :OP].set(params["w_out"])
    b_out_p = jnp.zeros((1, OPP), jnp.float32).at[:, :OP].set(params["b_out"])

    out_padded = pl.pallas_call(
        _a3tgcn_fused_kernel,
        out_shape=jax.ShapeDtypeStruct((N, OPP), jnp.float32),
        # No grid: the whole problem fits in VMEM; single invocation, whole-array blocks.
    )(a_hat.astype(jnp.float32), x_flat,
      w_gates, b_gates, s_prob, w_out_p, b_out_p)

    return out_padded[:, :OP]


def build_gcn_adjacency(edge_index, num_nodes):
    """Dense D^-1/2 (A + I) D^-1/2 with edge_weight=None (all ones). JAX glue."""
    src, dst = edge_index
    a = jnp.zeros((num_nodes, num_nodes), jnp.float32)
    a = a.at[src, dst].add(1.0)
    a = a + jnp.eye(num_nodes, dtype=jnp.float32)          # add_self_loops=True
    deg = jnp.sum(a, axis=1)
    dinv = jnp.where(deg > 0, 1.0 / jnp.sqrt(deg), 0.0)
    return dinv[:, None] * a * dinv[None, :]


def reference(a_hat, x_nfp, params):
    """Per-period reference with the ORIGINAL (unfused) parameters."""
    N, F, P = x_nfp.shape
    probs = jax.nn.softmax(params["attention"])
    acc = jnp.zeros((N, HIDDEN), jnp.float32)
    for t in range(P):
        ax = a_hat @ x_nfp[:, :, t]
        cz = ax @ params["w_zc"] + params["b_zc"]
        ch = ax @ params["w_hc"] + params["b_hc"]
        z = jax.nn.sigmoid(cz @ params["w_zl"] + params["b_zl"])
        ht = jnp.tanh(ch @ params["w_hl"] + params["b_hl"])
        acc = acc + probs[t] * (1.0 - z) * ht
    h = jax.nn.relu(acc)
    return h @ params["w_out"] + params["b_out"]


if __name__ == "__main__":
    N, F, P, OP = 16, 4, 8, 4    # nodes, node_features, periods, output_periods

    key = jax.random.PRNGKey(0)
    keys = jax.random.split(key, 12)
    x = jax.random.normal(keys[0], (N, F, P), jnp.float32)

    # deterministic synthetic parameters (shapes per module __init__)
    params = {
        "attention": jax.random.uniform(keys[1], (P,), jnp.float32),
        "w_zc": 0.1 * jax.random.normal(keys[2], (F, HIDDEN), jnp.float32),
        "b_zc": 0.1 * jax.random.normal(keys[3], (1, HIDDEN), jnp.float32),
        "w_hc": 0.1 * jax.random.normal(keys[4], (F, HIDDEN), jnp.float32),
        "b_hc": 0.1 * jax.random.normal(keys[5], (1, HIDDEN), jnp.float32),
        # first HIDDEN columns of Linear(2*HIDDEN, HIDDEN), transposed (H=0 path)
        "w_zl": 0.1 * jax.random.normal(keys[6], (HIDDEN, HIDDEN), jnp.float32),
        "b_zl": 0.1 * jax.random.normal(keys[7], (1, HIDDEN), jnp.float32),
        "w_hl": 0.1 * jax.random.normal(keys[8], (HIDDEN, HIDDEN), jnp.float32),
        "b_hl": 0.1 * jax.random.normal(keys[9], (1, HIDDEN), jnp.float32),
        "w_out": 0.1 * jax.random.normal(keys[10], (HIDDEN, OP), jnp.float32),
        "b_out": 0.1 * jax.random.normal(keys[11], (1, OP), jnp.float32),
    }

    # deterministic bidirectional ring graph, edge_weight=None (ones)
    src = jnp.arange(N, dtype=jnp.int32)
    dst = (src + 1) % N
    edge_index = jnp.stack([jnp.concatenate([src, dst]),
                            jnp.concatenate([dst, src])], axis=0)   # (2, 2N)
    a_hat = build_gcn_adjacency(edge_index, N)

    out = a3tgcn_forward(a_hat, x, params)
    out = jax.block_until_ready(out)

    ref = reference(a_hat, x, params)
    assert out.shape == (N, OP)
    assert jnp.allclose(out, ref, atol=2e-4, rtol=2e-3), (
        float(jnp.max(jnp.abs(out - ref))))
    print("KERNEL_OK")
</pallas_src>

<mosaic_0001>
module attributes {stable_mosaic.version = 11 : i64} {
  func.func @_a3tgcn_fused_kernel(%arg0: memref<16x16xf32, #tpu.memory_space<vmem>>, %arg1: memref<16x32xf32, #tpu.memory_space<vmem>>, %arg2: memref<32x512xf32, #tpu.memory_space<vmem>>, %arg3: memref<1x512xf32, #tpu.memory_space<vmem>>, %arg4: memref<256x32xf32, #tpu.memory_space<vmem>>, %arg5: memref<32x128xf32, #tpu.memory_space<vmem>>, %arg6: memref<1x128xf32, #tpu.memory_space<vmem>>, %arg7: memref<16x128xf32, #tpu.memory_space<vmem>>) attributes {dimension_semantics = [], scalar_prefetch = 0 : i64, scratch_operands = 0 : i64, tpu.core_type = #tpu.core_type<tc>} {
    %c0 = arith.constant 0 : index
    %c0_0 = arith.constant 0 : index
    %0 = vector.load %arg0[%c0, %c0_0] : memref<16x16xf32, #tpu.memory_space<vmem>>, vector<16x16xf32>
    %c0_1 = arith.constant 0 : index
    %c0_2 = arith.constant 0 : index
    %1 = vector.load %arg1[%c0_1, %c0_2] : memref<16x32xf32, #tpu.memory_space<vmem>>, vector<16x32xf32>
    %cst = arith.constant dense<0.000000e+00> : vector<16x32xf32>
    %2 = tpu.matmul %0, %1, %cst {dimension_numbers = #tpu.dot_dimension_numbers<[1], [0], [0], [1], [0, 0, 1, 1], [], []>} : vector<16x16xf32>, vector<16x32xf32>, vector<16x32xf32> -> vector<16x32xf32>
    %c0_3 = arith.constant 0 : index
    %c0_4 = arith.constant 0 : index
    %3 = vector.load %arg2[%c0_3, %c0_4] : memref<32x512xf32, #tpu.memory_space<vmem>>, vector<32x512xf32>
    %cst_5 = arith.constant dense<0.000000e+00> : vector<16x512xf32>
    %4 = tpu.matmul %2, %3, %cst_5 {dimension_numbers = #tpu.dot_dimension_numbers<[1], [0], [0], [1], [0, 0, 1, 1], [], []>} : vector<16x32xf32>, vector<32x512xf32>, vector<16x512xf32> -> vector<16x512xf32>
    %c0_6 = arith.constant 0 : index
    %c0_7 = arith.constant 0 : index
    %5 = vector.load %arg3[%c0_6, %c0_7] : memref<1x512xf32, #tpu.memory_space<vmem>>, vector<1x512xf32>
    %6 = vector.broadcast %5 : vector<1x512xf32> to vector<16x512xf32>
    %7 = arith.addf %4, %6 : vector<16x512xf32>
    %8 = vector.extract_strided_slice %7 {offsets = [0, 0], sizes = [16, 256], strides = [1, 1]} : vector<16x512xf32> to vector<16x256xf32>
    %9 = arith.negf %8 : vector<16x256xf32>
    %10 = math.exp %9 : vector<16x256xf32>
    %cst_8 = arith.constant 1.000000e+00 : f32
    %11 = vector.broadcast %cst_8 : f32 to vector<16x256xf32>
    %12 = arith.addf %11, %10 : vector<16x256xf32>
    %13 = arith.divf %11, %12 : vector<16x256xf32>
    %14 = vector.extract_strided_slice %7 {offsets = [0, 256], sizes = [16, 256], strides = [1, 1]} : vector<16x512xf32> to vector<16x256xf32>
    %15 = math.tanh %14 : vector<16x256xf32>
    %cst_9 = arith.constant 1.000000e+00 : f32
    %16 = vector.broadcast %cst_9 : f32 to vector<16x256xf32>
    %17 = arith.subf %16, %13 : vector<16x256xf32>
    %18 = arith.mulf %17, %15 : vector<16x256xf32>
    %c0_10 = arith.constant 0 : index
    %c0_11 = arith.constant 0 : index
    %19 = vector.load %arg4[%c0_10, %c0_11] : memref<256x32xf32, #tpu.memory_space<vmem>>, vector<256x32xf32>
    %cst_12 = arith.constant dense<0.000000e+00> : vector<16x32xf32>
    %20 = tpu.matmul %18, %19, %cst_12 {dimension_numbers = #tpu.dot_dimension_numbers<[1], [0], [0], [1], [0, 0, 1, 1], [], []>} : vector<16x256xf32>, vector<256x32xf32>, vector<16x32xf32> -> vector<16x32xf32>
    %cst_13 = arith.constant 0.000000e+00 : f32
    %21 = vector.broadcast %cst_13 : f32 to vector<16x32xf32>
    %22 = arith.maximumf %20, %21 : vector<16x32xf32>
    %c0_14 = arith.constant 0 : index
    %c0_15 = arith.constant 0 : index
    %23 = vector.load %arg5[%c0_14, %c0_15] : memref<32x128xf32, #tpu.memory_space<vmem>>, vector<32x128xf32>
    %cst_16 = arith.constant dense<0.000000e+00> : vector<16x128xf32>
    %24 = tpu.matmul %22, %23, %cst_16 {dimension_numbers = #tpu.dot_dimension_numbers<[1], [0], [0], [1], [0, 0, 1, 1], [], []>} : vector<16x32xf32>, vector<32x128xf32>, vector<16x128xf32> -> vector<16x128xf32>
    %c0_17 = arith.constant 0 : index
    %c0_18 = arith.constant 0 : index
    %25 = vector.load %arg6[%c0_17, %c0_18] : memref<1x128xf32, #tpu.memory_space<vmem>>, vector<1x128xf32>
    %26 = vector.broadcast %25 : vector<1x128xf32> to vector<16x128xf32>
    %27 = arith.addf %24, %26 : vector<16x128xf32>
    %c0_19 = arith.constant 0 : index
    %c0_20 = arith.constant 0 : index
    %28 = vector.load %arg7[%c0_19, %c0_20] : memref<16x128xf32, #tpu.memory_space<vmem>>, vector<16x128xf32>
    tpu.vector_store %arg7[%c0_19, %c0_20], %27 {strides = array<i32>} : memref<16x128xf32, #tpu.memory_space<vmem>>, vector<16x128xf32>,
    return
  }
}

</mosaic_0001>

<bundles_post_ra>
// kernel: tpu_custom_call.1
= control target key start
LH: loop header
LB: loop body
LE: loop exit
PB: predicated region body
PF: predicated region fallthrough
CT: control target
= control target key end

     0   :  { %vm31_vm0 = vcmask 130048   ;;  %s996_s0 = inlined_call_operand.vmem [shape: f32[16,16], index: 0, kind: input, shape index: {}]   ;;  %s997_s1 = inlined_call_operand.vmem [shape: f32[16,32], index: 1, kind: input, shape index: {}]   ;;  %s998_s2 = inlined_call_operand.vmem [shape: f32[32,512], index: 2, kind: input, shape index: {}]   ;;  %s999_s3 = inlined_call_operand.vmem [shape: f32[1,512], index: 3, kind: input, shape index: {}]   ;;  %s1000_s4 = inlined_call_operand.vmem [shape: f32[256,32], index: 4, kind: input, shape index: {}]   ;;  %s1001_s5 = inlined_call_operand.vmem [shape: f32[32,128], index: 5, kind: input, shape index: {}]   ;;  %s1002_s6 = inlined_call_operand.vmem [shape: f32[1,128], index: 6, kind: input, shape index: {}]   ;;  %s1003_s7 = inlined_call_operand.hbm [shape: f32[16,128], index: 7, kind: output, shape index: {}]  }
   0x1   :  { %v29_v0 = vld [vmem:[%s997_s1] sm:$0xff]  ;;  %v30_v1 = vld [vmem:[%s997_s1 + $0x8] sm:$0xff] }
   0x2   :  { %v27_v2 = vld [vmem:[%s996_s0] sm:$0xff]  ;;  %v646_v3 = vpack.c.bf16 %v30_v1, %v29_v0  ;;  %v114_v4 = vld [vmem:[%s998_s2 + $0x8] sm:$0xff] }
   0x3   :  { %632 = vmatprep.mubr.msk.f32.mxu0 %vm31_vm0, %v27_v2  ;;  %v118_v5 = vld [vmem:[%s998_s2 + $0x28] sm:$0xff]  ;;  %v113_v7 = vld [vmem:[%s998_s2] sm:$0xff] }
   0x4   :  { %v650_v6 = vpack.c.bf16 %v118_v5, %v114_v4  ;;  %v117_v8 = vld [vmem:[%s998_s2 + $0x20] sm:$0xff]  ;;  %v122_v9 = vld [vmem:[%s998_s2 + $0x48] sm:$0xff]  ;;  %647 = vmatprep.subr.bf16.mxu0 %v646_v3 }
   0x5   :  { %v126_v10 = vld [vmem:[%s998_s2 + $0x68] sm:$0xff]  ;;  %649 = vmatpush3.bf16.msra.mxu0 %v646_v3  ;;  %v652_v12 = vpack.c.bf16 %v117_v8, %v113_v7 }
   0x6   :  { %v28_v11 = vld [vmem:[%s996_s0 + $0x8] sm:$0xff] }
   0x7   :  { %12 = vsyncpa [#allocation3], 0  ;;  %651 = vmatprep.subr.bf16.mxu0 %v650_v6  ;;  %v654_v13 = vpack.c.bf16 %v126_v10, %v122_v9  ;;  %v121_v14 = vld [vmem:[%s998_s2 + $0x40] sm:$0xff]  ;;  %v116_v17 = vld [vmem:[%s998_s2 + $0x18] sm:$0xff]  ;;  %v758_v20 = vmov 0.0   ;;  %vm151_vm1 = vcmask 261120  }
   0x8   :  { %v125_v15 = vld [vmem:[%s998_s2 + $0x60] sm:$0xff]  ;;  %633 = vmatmul.mubr.msk.f32.vlgmr.msra.gmra.mrb[0].mxu0 %vm31_vm0, %v28_v11  ;;  %v120_v18 = vld [vmem:[%s998_s2 + $0x38] sm:$0xff]  ;;  %v115_v21 = vld [vmem:[%s998_s2 + $0x10] sm:$0xff] }
   0x9   :  { %653 = vmatpush1.bf16.msra.mxu0 %v652_v12  ;;  %v656_v16 = vpack.c.bf16 %v125_v15, %v121_v14  ;;  %v658_v19 = vpack.c.bf16 %v120_v18, %v116_v17  ;;  %222 = vmatprep.mubr.f32.mxu0 %v758_v20  ;;  %v119_v22 = vld [vmem:[%s998_s2 + $0x30] sm:$0xff]  ;;  %v124_v23 = vld [vmem:[%s998_s2 + $0x58] sm:$0xff]  ;;  %v364_v32 = vld [vmem:[%s1000_s4 + $0x80] sm:$0xff] }
   0xa   :  { %655 = vmatprep.subr.bf16.mxu0 %v654_v13  ;;  %v128_v24 = vld [vmem:[%s998_s2 + $0x78] sm:$0xff]  ;;  %v660_v25 = vpack.c.bf16 %v119_v22, %v115_v21  ;;  %v123_v28 = vld [vmem:[%s998_s2 + $0x50] sm:$0xff]  ;;  %v365_v33 = vld [vmem:[%s1000_s4 + $0x88] sm:$0xff] }
   0xb   :  { %v662_v27 = vpack.c.bf16 %v128_v24, %v124_v23  ;;  %v127_v29 = vld [vmem:[%s998_s2 + $0x70] sm:$0xff]  ;;  %v666_v34 = vpack.c.bf16 %v365_v33, %v364_v32  ;;  %v348_v35 = vld [vmem:[%s1000_s4] sm:$0xff]  ;;  %v349_v36 = vld [vmem:[%s1000_s4 + $0x8] sm:$0xff] }
   0xc   :  { %v664_v31 = vpack.c.bf16 %v127_v29, %v123_v28  ;;  %v668_v37 = vpack.c.bf16 %v349_v36, %v348_v35  ;;  %v366_v38 = vld [vmem:[%s1000_s4 + $0x90] sm:$0xff]  ;;  %v367_v39 = vld [vmem:[%s1000_s4 + $0x98] sm:$0xff]  ;;  %v368_v44 = vld [vmem:[%s1000_s4 + $0xa0] sm:$0xff] }
   0xd   :  { %657 = vmatpush1.bf16.msra.mxu0 %v656_v16  ;;  %667 = vmatprep.subr.bf16.mxu1 %v666_v34  ;;  %v670_v40 = vpack.c.bf16 %v367_v39, %v366_v38  ;;  %v350_v41 = vld [vmem:[%s1000_s4 + $0x10] sm:$0xff]  ;;  %v351_v42 = vld [vmem:[%s1000_s4 + $0x18] sm:$0xff]  ;;  %v369_v45 = vld [vmem:[%s1000_s4 + $0xa8] sm:$0xff]  ;;  %v131_v16 = vlaneseq }
   0xe   :  { %659 = vmatprep.subr.bf16.mxu0 %v658_v19  ;;  %669 = vmatpush3.bf16.msra.mxu1 %v668_v37  ;;  %v672_v43 = vpack.c.bf16 %v351_v42, %v350_v41  ;;  %v674_v46 = vpack.c.bf16 %v369_v45, %v368_v44  ;;  %v352_v47 = vld [vmem:[%s1000_s4 + $0x20] sm:$0xff]  ;;  %v353_v48 = vld [vmem:[%s1000_s4 + $0x28] sm:$0xff]  ;;  %v370_v50 = vld [vmem:[%s1000_s4 + $0xb0] sm:$0xff] }
   0xf   :  { %671 = vmatprep.subr.bf16.mxu1 %v670_v40  ;;  %v676_v49 = vpack.c.bf16 %v353_v48, %v352_v47  ;;  %v371_v51 = vld [vmem:[%s1000_s4 + $0xb8] sm:$0xff]  ;;  %v354_v53 = vld [vmem:[%s1000_s4 + $0x30] sm:$0xff]  ;;  %v372_v56 = vld [vmem:[%s1000_s4 + $0xc0] sm:$0xff]  ;;  %v132_v17 = vshrl.u32 %v131_v16, 7 }
  0x10   :  { %v678_v52 = vpack.c.bf16 %v371_v51, %v370_v50  ;;  %v355_v54 = vld [vmem:[%s1000_s4 + $0x38] sm:$0xff]  ;;  %v373_v57 = vld [vmem:[%s1000_s4 + $0xc8] sm:$0xff]  ;;  %v356_v59 = vld [vmem:[%s1000_s4 + $0x40] sm:$0xff] }
  0x11   :  { %v680_v55 = vpack.c.bf16 %v355_v54, %v354_v53  ;;  %v682_v58 = vpack.c.bf16 %v373_v57, %v372_v56  ;;  %v357_v60 = vld [vmem:[%s1000_s4 + $0x48] sm:$0xff]  ;;  %v374_v62 = vld [vmem:[%s1000_s4 + $0xd0] sm:$0xff]  ;;  %v375_v63 = vld [vmem:[%s1000_s4 + $0xd8] sm:$0xff]  ;;  %v133_v18 = vsub.s32 0, %v132_v17  ;;  %v141_v35 = vsub.s32 2, %v132_v17 }
  0x12   :  { %673 = vmatpush3.bf16.msra.mxu1 %v672_v43  ;;  %v684_v61 = vpack.c.bf16 %v357_v60, %v356_v59  ;;  %v686_v0 = vpack.c.bf16 %v375_v63, %v374_v62  ;;  %v358_v1 = vld [vmem:[%s1000_s4 + $0x50] sm:$0xff]  ;;  %v359_v2 = vld [vmem:[%s1000_s4 + $0x58] sm:$0xff]  ;;  %v376_v4 = vld [vmem:[%s1000_s4 + $0xe0] sm:$0xff]  ;;  %v145_v37 = vsub.s32 3, %v132_v17 }
  0x13   :  { %675 = vmatprep.subr.bf16.mxu1 %v674_v46  ;;  %v688_v3 = vpack.c.bf16 %v359_v2, %v358_v1  ;;  %v377_v5 = vld [vmem:[%s1000_s4 + $0xe8] sm:$0xff]  ;;  %v360_v6 = vld [vmem:[%s1000_s4 + $0x60] sm:$0xff]  ;;  %v378_v9 = vld [vmem:[%s1000_s4 + $0xf0] sm:$0xff] }
  0x14   :  { %v690_v7 = vpack.c.bf16 %v377_v5, %v376_v4  ;;  %v361_v8 = vld [vmem:[%s1000_s4 + $0x68] sm:$0xff]  ;;  %v379_v10 = vld [vmem:[%s1000_s4 + $0xf8] sm:$0xff]  ;;  %v362_v13 = vld [vmem:[%s1000_s4 + $0x70] sm:$0xff] }
  0x15   :  { %v692_v11 = vpack.c.bf16 %v361_v8, %v360_v6  ;;  %v694_v12 = vpack.c.bf16 %v379_v10, %v378_v9  ;;  %v363_v14 = vld [vmem:[%s1000_s4 + $0x78] sm:$0xff]  ;;  %v129_v19 = vld [vmem:[%s999_s3] sm:$0xf]  ;;  %v458_v8 = vld [vmem:[%s1001_s5 + $0x8] sm:$0xff] }
  0x16   :  { %677 = vmatpush3.bf16.msra.mxu1 %v676_v49  ;;  %v696_v15 = vpack.c.bf16 %v363_v14, %v362_v13  ;;  %v134_v21 = vrot.slane %v129_v19, %v133_v18  ;;  %v142_v39 = vrot.slane %v129_v19, %v141_v35  ;;  %v146_v41 = vrot.slane %v129_v19, %v145_v37  ;;  %v459_v10 = vld [vmem:[%s1001_s5 + $0x10] sm:$0xff] }
  0x17   :  { %679 = vmatprep.subr.bf16.mxu1 %v678_v52 }
  0x1a   :  { %681 = vmatpush3.bf16.msra.mxu1 %v680_v55 }
  0x1b   :  { %683 = vmatprep.subr.bf16.mxu1 %v682_v58 }
  0x1e   :  { %685 = vmatpush3.bf16.msra.mxu1 %v684_v61 }
  0x1f   :  { %687 = vmatprep.subr.bf16.mxu1 %v686_v0 }
  0x22   :  { %689 = vmatpush3.bf16.msra.mxu1 %v688_v3 }
  0x23   :  { %691 = vmatprep.subr.bf16.mxu1 %v690_v7  ;;  %v457_v7 = vld [vmem:[%s1001_s5] sm:$0xff] }
  0x24   :  { %v698_v9 = vpack.c.bf16 %v458_v8, %v457_v7 }
  0x26   :  { %693 = vmatpush3.bf16.msra.mxu1 %v692_v11  ;;  %v460_v11 = vld [vmem:[%s1001_s5 + $0x18] sm:$0xff]  ;;  %s759_s5 = smov [#allocation2]  }
  0x27   :  { %695 = vmatprep.subr.bf16.mxu1 %v694_v12  ;;  %v702_v12 = vpack.c.bf16 %v460_v11, %v459_v10  ;;  %s556_s12 = sshll.u32 %s759_s5, 4  ;;  %s557_s12 = int_to_ptr.vmem [resolvable:$true] %s556_s12 }
  0x28   :  { %s734_s1 = scalar_lea.vmem %s557_s12, 256  ;;  %p739_p1 = scmp.lt.s32.totalorder %s557_s12, %s557_s12 }
  0x29   :  { %p735_p0 = scmp.ne.s32.totalorder %s557_s12, %s734_s1  ;;  %p740_p2 = scmp.lt.s32.totalorder %s734_s1, %s734_s1 }
  0x2a   :  { %697 = vmatpush3.bf16.msra.mxu1 %v696_v15 }
  0x2b   :  { %p741_p3 = por %p740_p2, %p739_p1 }
  0x2d   :  { %p742_p4 = pnand %p741_p3, %p735_p0 }
  0xdb   :  { %v634_v26 = vpop.f32.mrb[0].mxu0 }
  0xdc   :  { %v104_v30 = vpop.f32.mrb[1].mxu0 }
  0xdd   :  { %569 = vmatmul.mubr.msk.f32.vlgmr.msra.gmra.mrb[2].mxu0 %vm151_vm1, %v104_v30 }
  0xde   :  { %661 = vmatpush1.bf16.msra.mxu0 %v660_v25  ;;  %228 = vmatprep.mubr.f32.mxu0 %v758_v20 }
  0xdf   :  { %663 = vmatprep.subr.bf16.mxu0 %v662_v27 }
  0xe1   :  { %570 = vmatmul.mubr.msk.f32.gmra.mrb[4].mxu0 %vm151_vm1, %v634_v26 }
  0xe2   :  { %665 = vmatpush1.bf16.msra.mxu0 %v664_v31  ;;  %299 = vmatprep.mubr.f32.mxu0 %v758_v20 }
  0xe3   :  { %699 = vmatprep.subr.bf16.mxu0 %v698_v9 }
  0xe5   :  { %571 = vmatmul.mubr.msk.f32.vlgmr.msra.gmra.mrb[6].mxu0 %vm151_vm1, %v104_v30 }
  0xe6   :  { %305 = vmatprep.mubr.f32.mxu0 %v758_v20  ;;  %v137_v20 = vsub.s32 1, %v132_v17  ;;  %701 = vmatpush3.bf16.msra.mxu0 %v698_v9 }
  0xe7   :  { %703 = vmatprep.subr.bf16.mxu0 %v702_v12 }
  0xe8   :  { %v138_v22 = vrot.slane %v129_v19, %v137_v20 }
  0xe9   :  { %572 = vmatmul.mubr.msk.f32.gmra.mrb[8].mxu0 %vm151_vm1, %v634_v26 }
  0xea   :  { %705 = vmatpush3.bf16.msra.mxu0 %v702_v12 }
 0x1b0   :  { %v224_v23 = vpop.f32.mrb[2].mxu0 }
 0x1b1   :  { %v225_v24 = vadd.f32 %v224_v23, %v134_v21  ;;  %v226_v25 = vpop.f32.mrb[3].mxu0 }
 0x1b2   :  { %v227_v26 = vadd.f32 %v226_v25, %v138_v22 }
 0x1b3   :  { %v573_v27 = vmul.f32 -1.442695, %v225_v24 }
 0x1b4   :  { %v574_v28 = vmul.f32 -1.442695, %v227_v26  ;;  %v230_v29 = vpop.f32.mrb[4].mxu0 }
 0x1b5   :  { %710 = vpow2.f32 %v573_v27  ;;  %v231_v30 = vadd.f32 %v230_v29, %v134_v21  ;;  %v232_v31 = vpop.f32.mrb[5].mxu0  ;;  %v577_v21 = vld [vmem:[%s1002_s6] ss:$0 sm:$0xff] }
 0x1b6   :  { %712 = vpow2.f32 %v574_v28  ;;  %v233_v32 = vadd.f32 %v232_v31, %v138_v22 }
 0x1b7   :  { %v575_v33 = vmul.f32 -1.442695, %v231_v30 }
 0x1b8   :  { %v576_v34 = vmul.f32 -1.442695, %v233_v32  ;;  %v301_v36 = vpop.f32.mrb[6].mxu0 }
 0x1b9   :  { %714 = vpow2.f32 %v575_v33  ;;  %v303_v38 = vpop.f32.mrb[7].mxu0  ;;  %v302_v46 = vadd.f32 %v301_v36, %v142_v39 }
 0x1ba   :  { %716 = vpow2.f32 %v576_v34  ;;  %v304_v48 = vadd.f32 %v303_v38, %v146_v41 }
 0x1bc   :  { %v307_v40 = vpop.f32.mrb[8].mxu0 }
 0x1bd   :  { %v309_v42 = vpop.f32.mrb[9].mxu0  ;;  %v308_v52 = vadd.f32 %v307_v40, %v142_v39 }
 0x1be   :  { %v310_v54 = vadd.f32 %v309_v42, %v146_v41 }
 0x1bf   :  { %v711_v43 = vpop.eup %710 }
 0x1c0   :  { %v713_v44 = vpop.eup %712  ;;  %v324_v45 = vadd.f32 1.0, %v711_v43 }
 0x1c1   :  { %v325_v47 = vadd.f32 1.0, %v713_v44 }
 0x1c2   :  { %718 = vrcp.f32 %v324_v45 }
 0x1c3   :  { %v715_v49 = vpop.eup %714  ;;  %720 = vrcp.f32 %v325_v47 }
 0x1c4   :  { %v717_v50 = vpop.eup %716  ;;  %v326_v51 = vadd.f32 1.0, %v715_v49  ;;  %722 = vtanh.f32 %v302_v46 }
 0x1c5   :  { %v327_v53 = vadd.f32 1.0, %v717_v50  ;;  %724 = vtanh.f32 %v304_v48 }
 0x1c6   :  { %726 = vrcp.f32 %v326_v51 }
 0x1c7   :  { %728 = vrcp.f32 %v327_v53 }
 0x1c8   :  { %730 = vtanh.f32 %v308_v52 }
 0x1c9   :  { %732 = vtanh.f32 %v310_v54 }
 0x1cc   :  { %v719_v55 = vpop.eup %718 }
 0x1cd   :  { %v721_v56 = vpop.eup %720  ;;  %v340_v57 = vsub.f32 1.0, %v719_v55 }
 0x1ce   :  { %v723_v58 = vpop.eup %722  ;;  %v341_v59 = vsub.f32 1.0, %v721_v56 }
 0x1cf   :  { %v725_v60 = vpop.eup %724  ;;  %v344_v61 = vmul.f32 %v723_v58, %v340_v57 }
 0x1d0   :  { %v727_v62 = vpop.eup %726  ;;  %v345_v63 = vmul.f32 %v725_v60, %v341_v59 }
 0x1d1   :  { %v729_v0 = vpop.eup %728  ;;  %v342_v1 = vsub.f32 1.0, %v727_v62 }
 0x1d2   :  { %v731_v2 = vpop.eup %730  ;;  %444 = vmatprep.mubr.f32.mxu1 %v345_v63  ;;  %v343_v3 = vsub.f32 1.0, %v729_v0 }
 0x1d3   :  { %v733_v4 = vpop.eup %732  ;;  %445 = vmatmul.mubr.f32.vlgmr.msra.gmra.mrb[0].mxu1 %v344_v61  ;;  %v346_v5 = vmul.f32 %v731_v2, %v342_v1 }
 0x1d4   :  { %v347_v6 = vmul.f32 %v733_v4, %v343_v3 }
 0x1d6   :  { %449 = vmatprep.mubr.f32.mxu1 %v347_v6 }
 0x1d7   :  { %450 = vmatmul.mubr.f32.gmra.mrb[2].mxu1 %v346_v5 }
 0x2a6   :  { %v616_v13 = vpop.f32.mrb[0].mxu1 }
 0x2a7   :  { %v617_v14 = vpop.f32.mrb[1].mxu1 }
 0x2a8   :  { %v618_v15 = vadd.f32 %v617_v14, %v616_v13 }
 0x2aa   :  { %v455_v16 = vmax.f32 %v618_v15, 0.0  ;;  %v619_v17 = vpop.f32.mrb[2].mxu1 }
 0x2ab   :  { %v620_v18 = vpop.f32.mrb[3].mxu1 }
 0x2ac   :  { %v621_v19 = vadd.f32 %v620_v18, %v619_v17  ;;  %643 = vmatprep.mubr.msk.f32.mxu0 %vm151_vm1, %v455_v16 }
 0x2ae   :  { %v456_v20 = vmax.f32 %v621_v19, 0.0 }
 0x2b0   :  { %644 = vmatmul.mubr.msk.f32.vlgmr.msra.gmra.mrb[10].mxu0 %vm151_vm1, %v456_v20 }
 0x383   :  { %v645_v22 = vpop.f32.mrb[10].mxu0 }
 0x384   :  { %v546_v23 = vadd.f32 %v645_v22, %v577_v21  ;;  %v540_v24 = vpop.f32.mrb[11].mxu0 }
 0x385   :  { %v541_v25 = vadd.f32 %v577_v21, %v540_v24 }
 0x386   :  { %550 = vst [vmem:[#allocation2 + $0x8] sm:$0xff] %v546_v23 }
 0x387   :  { %549 = vst [vmem:[#allocation2] sm:$0xff] %v541_v25 }
 0x388   :  { %745 = shalt.err (!%p742_p4)
}
 0x389   :  { %s746_s6 = scalar_lea.hbm %s1003_s7, 256 }
 0x38a   :  { %p747_p5 = scmp.ne.s32.totalorder %s1003_s7, %s746_s6  ;;  %p750_p6 = scmp.lt.u32.totalorder %s746_s6, %s1003_s7 }
 0x38c   :  { %p752_p7 = pnand %p750_p6, %p747_p5 }
 0x38e   :  { %755 = shalt.err (!%p752_p7)
}
 0x38f   :  { %s760_s18 = smov 128   ;;  %s761_s19 = smov 8  }
 0x390   :  { %562 = dma.vmem_to_hbm [thread:$0]  %s557_s12, 256, %s1003_s7, [#allocation3], %s760_s18, %s760_s18, %s761_s19  }
 0x391   :  { %756 = dma.done.wait [#allocation3], 256  }
 0x392   :  { %757 = vsyncadd [#allocation3], 4294967040 }
 0x393   :  { %566 = vsyncpa [#allocation3], 1 }

</bundles_post_ra>
